<compile_context>
chip_gen: v6e
topology: v6e:2x2x1
jax: 0.10.0
libtpu: 0.0.40
codegen_flags: <defaults>
</compile_context>

<pallas_src>
import jax
import jax.numpy as jnp
from jax import lax
from jax.experimental import pallas as pl
from jax.experimental.pallas import tpu as pltpu


# ---------------------------------------------------------------------------
# Fused kernel: conv3x3+bn+relu, conv3x3+bn, +identity, relu  (Nb images / step)
# ---------------------------------------------------------------------------
def _make_fused_kernel(H, W, Nb, C, Cp, SUB):
    HW = H * W
    LANES = Nb * HW          # Nb images side by side on the lane axis
    K = SUB + 9 * Cp         # stacked contraction dim: bias block + 9 tap blocks

    def kernel(x_ref, mask_ref, w1_ref, w2_ref, o_ref, op_ref):
        # x_ref   : (Nb, Cp, HW)        padded-channel input images (f32)
        # mask_ref: (9, 1, LANES)       0/1 boundary masks per tap (stack dtype)
        # w1_ref  : (Cp, K)             conv1 weights, BN1 scale folded, bias in col 0
        # w2_ref  : (Cp, K)             conv2 weights, BN2 scale folded, bias in col 0
        # o_ref   : (Nb, C, HW)         output images
        # op_ref  : (K, LANES) scratch  stacked matmul operand (VMEM)
        stack_dtype = op_ref.dtype

        # One (Cp, Nb*HW) slab; image b occupies lanes [b*HW, (b+1)*HW).
        if Nb == 1:
            x_f32 = x_ref[0]
        else:
            x_f32 = jnp.concatenate([x_ref[b] for b in range(Nb)], axis=1)
        x_f32 = x_f32.astype(jnp.float32)

        # Leading bias block: row 0 = ones (multiplies the bias column of the
        # weights), rows 1..SUB-1 = zeros (their weight columns are zero).
        row = lax.broadcasted_iota(jnp.int32, (SUB, LANES), 0)
        op_ref[pl.ds(0, SUB), :] = (row == 0).astype(stack_dtype)

        def stack_taps(slab):
            # slab: (Cp, LANES) stack_dtype.  The 3x3 "same" conv's shifted inputs
            # are produced with pltpu.roll (XLU, cheap) along the flattened lane
            # axis; zero padding is realized by precomputed 0/1 boundary masks
            # (which also zero every cross-image wrap).  Each tap is one aligned
            # row-block store into the stacked operand.
            for ky in range(3):
                for kx in range(3):
                    k = ky * 3 + kx
                    s = (ky - 1) * W + (kx - 1)          # flat source offset
                    if s == 0:
                        t = slab
                    else:
                        t = pltpu.roll(slab, shift=(-s) % LANES, axis=1) * mask_ref[k]
                    op_ref[pl.ds(SUB + k * Cp, Cp), :] = t

        # conv1 + BN1 (scale folded into weights, bias via the ones row) + ReLU:
        # ONE MXU matmul with contraction K = SUB + 9*Cp.
        stack_taps(x_f32.astype(stack_dtype))
        y1 = jnp.dot(w1_ref[...], op_ref[...], preferred_element_type=jnp.float32)
        y1 = jnp.maximum(y1, 0.0)

        # conv2 + BN2 (same folding): second single matmul.
        stack_taps(y1.astype(stack_dtype))
        y2 = jnp.dot(w2_ref[...], op_ref[...], preferred_element_type=jnp.float32)

        # + identity (f32, straight from the input slab) and final ReLU.
        y2 = jnp.maximum(y2 + x_f32, 0.0)

        # Lane-dense store per image, dropping padded channels.
        for b in range(Nb):
            o_ref[b] = y2[:C, b * HW:(b + 1) * HW].astype(o_ref.dtype)

    return kernel


# ---------------------------------------------------------------------------
# Host-side parameter prep (tiny tensors: done once, outside the kernel)
# ---------------------------------------------------------------------------
def _fold_bn(gamma, beta, mean, var, eps=1e-5):
    scale = gamma / jnp.sqrt(var + eps)
    bias = beta - mean * scale
    return scale, bias


def _prep_merged_weights(w_oihw, scale, bias, Cp, SUB, dtype):
    # Fold the BN scale into the conv weights, lay the 3x3 taps out along the
    # contraction axis as [bias col + zeros | tap0 | ... | tap8], zero-padding
    # both channel axes to Cp so every kernel-side row-block store is aligned.
    cout, cin = w_oihw.shape[0], w_oihw.shape[1]
    w = w_oihw * scale[:, None, None, None]
    w_taps = jnp.transpose(w, (2, 3, 0, 1)).reshape(9, cout, cin)   # k = ky*3 + kx
    K = SUB + 9 * Cp
    W = jnp.zeros((Cp, K), jnp.float32)
    W = W.at[:cout, 0].set(bias)                                    # bias column
    for k in range(9):
        W = W.at[:cout, SUB + k * Cp: SUB + k * Cp + cin].set(w_taps[k])
    return W.astype(dtype)


def _boundary_masks(H, W):
    # mask[k, 0, h*W + w] = 1 iff the source pixel (h+dy, w+dx) of tap k lies
    # inside the image (i.e. the tap does not read the zero padding).
    hh, ww = jnp.meshgrid(jnp.arange(H), jnp.arange(W), indexing="ij")
    rows = []
    for ky in range(3):
        for kx in range(3):
            dy, dx = ky - 1, kx - 1
            valid = ((hh + dy >= 0) & (hh + dy < H) &
                     (ww + dx >= 0) & (ww + dx < W))
            rows.append(valid.astype(jnp.float32).reshape(1, H * W))
    return jnp.stack(rows, axis=0)                                  # (9, 1, HW)


def _images_per_step(N, max_per_step=8):
    # Batch several images per grid step (amortize the ~0.35us/step overhead and
    # keep weights/masks resident) while keeping the grid length >= 2 so both
    # v7x TensorCores get work under dimension_semantics=("parallel",).
    if N >= 2 and N % 2 == 0:
        nb = min(N // 2, max_per_step)
    else:
        nb = 1
    while N % nb:
        nb -= 1
    return max(nb, 1)


# ---------------------------------------------------------------------------
# BasicBlock forward (NCHW in / NCHW out, like PyTorch; eval-mode BatchNorm)
# ---------------------------------------------------------------------------
def basic_block_forward(x_nchw, params, eps=1e-5, images_per_step=None):
    N, C, H, W = x_nchw.shape
    planes = params["w1"].shape[0]
    if planes != C:
        raise ValueError("fused BasicBlock kernel requires inplanes == planes "
                         "(stride=1, downsample=None)")
    HW = H * W
    nb = images_per_step if images_per_step is not None else _images_per_step(N)
    assert N % nb == 0
    LANES = nb * HW

    # Stacked-operand dtype: bf16 when channel blocks align to the packed (16,128)
    # tile (production widths -> bf16 VALU win on v6e/v7x), f32 otherwise.
    use_bf16 = (C % 16 == 0)
    stack_dtype = jnp.bfloat16 if use_bf16 else jnp.float32
    SUB = 16 if use_bf16 else 8
    Cp = ((C + SUB - 1) // SUB) * SUB
    K = SUB + 9 * Cp

    s1, b1 = _fold_bn(params["g1"], params["be1"], params["m1"], params["v1"], eps)
    s2, b2 = _fold_bn(params["g2"], params["be2"], params["m2"], params["v2"], eps)
    w1 = _prep_merged_weights(params["w1"], s1, b1, Cp, SUB, stack_dtype)   # (Cp, K)
    w2 = _prep_merged_weights(params["w2"], s2, b2, Cp, SUB, stack_dtype)   # (Cp, K)
    masks = jnp.tile(_boundary_masks(H, W), (1, 1, nb)).astype(stack_dtype)  # (9,1,LANES)

    x_flat = x_nchw.reshape(N, C, HW)              # free reshape of NCHW, no transpose
    if Cp > C:                                     # channel pad only if C % 8 != 0
        x_flat = jnp.pad(x_flat, ((0, 0), (0, Cp - C), (0, 0)))

    itemsize = jnp.dtype(stack_dtype).itemsize
    flops = 2 * (2 * 9 * C * C * HW) * N           # two 3x3 convs per image
    bytes_accessed = (N * Cp * HW + N * C * HW) * 4 + (w1.size + w2.size + masks.size) * itemsize

    out_flat = pl.pallas_call(
        _make_fused_kernel(H, W, nb, C, Cp, SUB),
        out_shape=jax.ShapeDtypeStruct((N, C, HW), x_nchw.dtype),
        grid_spec=pltpu.PrefetchScalarGridSpec(
            num_scalar_prefetch=0,
            grid=(N // nb,),
            in_specs=[
                pl.BlockSpec((nb, Cp, HW), lambda n: (n, 0, 0)),
                pl.BlockSpec((9, 1, LANES), lambda n: (0, 0, 0)),
                pl.BlockSpec((Cp, K), lambda n: (0, 0)),
                pl.BlockSpec((Cp, K), lambda n: (0, 0)),
            ],
            out_specs=pl.BlockSpec((nb, C, HW), lambda n: (n, 0, 0)),
            scratch_shapes=[pltpu.VMEM((K, LANES), stack_dtype)],
        ),
        compiler_params=pltpu.CompilerParams(
            dimension_semantics=("parallel",),
        ),
        cost_estimate=pl.CostEstimate(
            flops=flops, transcendentals=0, bytes_accessed=bytes_accessed),
    )(x_flat, masks, w1, w2)

    return out_flat.reshape(N, planes, H, W)


# ---------------------------------------------------------------------------
# Pure-JAX reference (for a correctness check)
# ---------------------------------------------------------------------------
def basic_block_reference(x, params, eps=1e-5):
    def conv(x, w):
        dn = lax.conv_dimension_numbers(x.shape, w.shape, ("NCHW", "OIHW", "NCHW"))
        return lax.conv_general_dilated(x, w, (1, 1), ((1, 1), (1, 1)),
                                        dimension_numbers=dn)

    def bn(x, g, b, m, v):
        g, b, m, v = (t[None, :, None, None] for t in (g, b, m, v))
        return (x - m) * g / jnp.sqrt(v + eps) + b

    out = conv(x, params["w1"])
    out = bn(out, params["g1"], params["be1"], params["m1"], params["v1"])
    out = jnp.maximum(out, 0.0)
    out = conv(out, params["w2"])
    out = bn(out, params["g2"], params["be2"], params["m2"], params["v2"])
    out = out + x
    return jnp.maximum(out, 0.0)


if __name__ == "__main__":
    key = jax.random.PRNGKey(0)
    # Small test shape; N=4 exercises both per-step batching (2 images/step) and
    # an even-length grid (2 steps) for v7x's two TensorCores.
    N, C, H, W = 4, 4, 16, 16      # inplanes = planes = 4, stride = 1
    planes = C

    ks = jax.random.split(key, 11)
    x = jax.random.normal(ks[0], (N, C, H, W), jnp.float32)

    params = {
        "w1": 0.1 * jax.random.normal(ks[1], (planes, C, 3, 3), jnp.float32),
        "w2": 0.1 * jax.random.normal(ks[2], (planes, planes, 3, 3), jnp.float32),
        "g1": 1.0 + 0.1 * jax.random.normal(ks[3], (planes,), jnp.float32),
        "be1": 0.1 * jax.random.normal(ks[4], (planes,), jnp.float32),
        "m1": 0.1 * jax.random.normal(ks[5], (planes,), jnp.float32),
        "v1": 0.5 + jnp.abs(jax.random.normal(ks[6], (planes,), jnp.float32)),
        "g2": 1.0 + 0.1 * jax.random.normal(ks[7], (planes,), jnp.float32),
        "be2": 0.1 * jax.random.normal(ks[8], (planes,), jnp.float32),
        "m2": 0.1 * jax.random.normal(ks[9], (planes,), jnp.float32),
        "v2": 0.5 + jnp.abs(jax.random.normal(ks[10], (planes,), jnp.float32)),
    }

    out = jax.block_until_ready(jax.jit(basic_block_forward)(x, params))
    ref = jax.block_until_ready(basic_block_reference(x, params))

    assert out.shape == (N, C, H, W), out.shape
    max_err = float(jnp.max(jnp.abs(out - ref)))
    assert jnp.allclose(out, ref, rtol=2e-2, atol=2e-2), max_err
    print("KERNEL_OK")
</pallas_src>

<mosaic_0001>
module attributes {stable_mosaic.version = 11 : i64} {
  func.func @kernel(%arg0: i32, %arg1: memref<2x8x256xf32, #tpu.memory_space<vmem>>, %arg2: memref<9x1x512xf32, #tpu.memory_space<vmem>>, %arg3: memref<8x80xf32, #tpu.memory_space<vmem>>, %arg4: memref<8x80xf32, #tpu.memory_space<vmem>>, %arg5: memref<2x4x256xf32, #tpu.memory_space<vmem>>, %arg6: memref<80x512xf32, #tpu.memory_space<vmem>>) attributes {dimension_semantics = [#tpu.dimension_semantics<parallel>], iteration_bounds = array<i64: 2>, scalar_prefetch = 0 : i64, scratch_operands = 1 : i64, tpu.core_type = #tpu.core_type<tc>, window_params = [{transform_indices = @transform_0, window_bounds = array<i64: 2, 8, 256>}, {pipeline_mode = #tpu.pipeline_mode<synchronous>, transform_indices = @transform_1, window_bounds = array<i64: 9, 1, 512>}, {pipeline_mode = #tpu.pipeline_mode<synchronous>, transform_indices = @transform_2, window_bounds = array<i64: 8, 80>}, {pipeline_mode = #tpu.pipeline_mode<synchronous>, transform_indices = @transform_3, window_bounds = array<i64: 8, 80>}, {transform_indices = @transform_4, window_bounds = array<i64: 2, 4, 256>}]} {
    %c0 = arith.constant 0 : index
    %c0_0 = arith.constant 0 : index
    %c0_1 = arith.constant 0 : index
    %0 = vector.load %arg1[%c0, %c0_0, %c0_1] : memref<2x8x256xf32, #tpu.memory_space<vmem>>, vector<1x8x256xf32>
    %1 = vector.shape_cast %0 : vector<1x8x256xf32> to vector<8x256xf32>
    %c1 = arith.constant 1 : index
    %c0_2 = arith.constant 0 : index
    %c0_3 = arith.constant 0 : index
    %2 = vector.load %arg1[%c1, %c0_2, %c0_3] : memref<2x8x256xf32, #tpu.memory_space<vmem>>, vector<1x8x256xf32>
    %3 = vector.shape_cast %2 : vector<1x8x256xf32> to vector<8x256xf32>
    %4 = tpu.concatenate %1, %3 in 1 : vector<8x256xf32>, vector<8x256xf32> -> vector<8x512xf32>
    %5 = tpu.iota {dimensions = array<i32: 0>} : vector<8x512xi32>
    %c0_i32 = arith.constant 0 : i32
    %6 = vector.broadcast %c0_i32 : i32 to vector<8x512xi32>
    %7 = arith.cmpi eq, %5, %6 : vector<8x512xi32>
    %8 = arith.extui %7 : vector<8x512xi1> to vector<8x512xi32>
    %9 = arith.sitofp %8 : vector<8x512xi32> to vector<8x512xf32>
    %c0_4 = arith.constant 0 : index
    %c0_5 = arith.constant 0 : index
    %10 = vector.load %arg6[%c0_4, %c0_5] : memref<80x512xf32, #tpu.memory_space<vmem>>, vector<8x512xf32>
    tpu.vector_store %arg6[%c0_4, %c0_5], %9 {strides = array<i32>} : memref<80x512xf32, #tpu.memory_space<vmem>>, vector<8x512xf32>,
    %c17_i32 = arith.constant 17 : i32
    %11 = tpu.dynamic_rotate %4 by %c17_i32 dim 1 : vector<8x512xf32>, i32 -> vector<8x512xf32>
    %c0_6 = arith.constant 0 : index
    %c0_7 = arith.constant 0 : index
    %c0_8 = arith.constant 0 : index
    %12 = vector.load %arg2[%c0_6, %c0_7, %c0_8] : memref<9x1x512xf32, #tpu.memory_space<vmem>>, vector<1x1x512xf32>
    %13 = vector.shape_cast %12 : vector<1x1x512xf32> to vector<1x512xf32>
    %14 = vector.broadcast %13 : vector<1x512xf32> to vector<8x512xf32>
    %15 = arith.mulf %11, %14 : vector<8x512xf32>
    %c8 = arith.constant 8 : index
    %c0_9 = arith.constant 0 : index
    %16 = vector.load %arg6[%c8, %c0_9] : memref<80x512xf32, #tpu.memory_space<vmem>>, vector<8x512xf32>
    tpu.vector_store %arg6[%c8, %c0_9], %15 {strides = array<i32>} : memref<80x512xf32, #tpu.memory_space<vmem>>, vector<8x512xf32>,
    %c16_i32 = arith.constant 16 : i32
    %17 = tpu.dynamic_rotate %4 by %c16_i32 dim 1 : vector<8x512xf32>, i32 -> vector<8x512xf32>
    %c1_10 = arith.constant 1 : index
    %c0_11 = arith.constant 0 : index
    %c0_12 = arith.constant 0 : index
    %18 = vector.load %arg2[%c1_10, %c0_11, %c0_12] : memref<9x1x512xf32, #tpu.memory_space<vmem>>, vector<1x1x512xf32>
    %19 = vector.shape_cast %18 : vector<1x1x512xf32> to vector<1x512xf32>
    %20 = vector.broadcast %19 : vector<1x512xf32> to vector<8x512xf32>
    %21 = arith.mulf %17, %20 : vector<8x512xf32>
    %c16 = arith.constant 16 : index
    %c0_13 = arith.constant 0 : index
    %22 = vector.load %arg6[%c16, %c0_13] : memref<80x512xf32, #tpu.memory_space<vmem>>, vector<8x512xf32>
    tpu.vector_store %arg6[%c16, %c0_13], %21 {strides = array<i32>} : memref<80x512xf32, #tpu.memory_space<vmem>>, vector<8x512xf32>,
    %c15_i32 = arith.constant 15 : i32
    %23 = tpu.dynamic_rotate %4 by %c15_i32 dim 1 : vector<8x512xf32>, i32 -> vector<8x512xf32>
    %c2 = arith.constant 2 : index
    %c0_14 = arith.constant 0 : index
    %c0_15 = arith.constant 0 : index
    %24 = vector.load %arg2[%c2, %c0_14, %c0_15] : memref<9x1x512xf32, #tpu.memory_space<vmem>>, vector<1x1x512xf32>
    %25 = vector.shape_cast %24 : vector<1x1x512xf32> to vector<1x512xf32>
    %26 = vector.broadcast %25 : vector<1x512xf32> to vector<8x512xf32>
    %27 = arith.mulf %23, %26 : vector<8x512xf32>
    %c24 = arith.constant 24 : index
    %c0_16 = arith.constant 0 : index
    %28 = vector.load %arg6[%c24, %c0_16] : memref<80x512xf32, #tpu.memory_space<vmem>>, vector<8x512xf32>
    tpu.vector_store %arg6[%c24, %c0_16], %27 {strides = array<i32>} : memref<80x512xf32, #tpu.memory_space<vmem>>, vector<8x512xf32>,
    %c1_i32 = arith.constant 1 : i32
    %29 = tpu.dynamic_rotate %4 by %c1_i32 dim 1 : vector<8x512xf32>, i32 -> vector<8x512xf32>
    %c3 = arith.constant 3 : index
    %c0_17 = arith.constant 0 : index
    %c0_18 = arith.constant 0 : index
    %30 = vector.load %arg2[%c3, %c0_17, %c0_18] : memref<9x1x512xf32, #tpu.memory_space<vmem>>, vector<1x1x512xf32>
    %31 = vector.shape_cast %30 : vector<1x1x512xf32> to vector<1x512xf32>
    %32 = vector.broadcast %31 : vector<1x512xf32> to vector<8x512xf32>
    %33 = arith.mulf %29, %32 : vector<8x512xf32>
    %c32 = arith.constant 32 : index
    %c0_19 = arith.constant 0 : index
    %34 = vector.load %arg6[%c32, %c0_19] : memref<80x512xf32, #tpu.memory_space<vmem>>, vector<8x512xf32>
    tpu.vector_store %arg6[%c32, %c0_19], %33 {strides = array<i32>} : memref<80x512xf32, #tpu.memory_space<vmem>>, vector<8x512xf32>,
    %c40 = arith.constant 40 : index
    %c0_20 = arith.constant 0 : index
    %35 = vector.load %arg6[%c40, %c0_20] : memref<80x512xf32, #tpu.memory_space<vmem>>, vector<8x512xf32>
    tpu.vector_store %arg6[%c40, %c0_20], %4 {strides = array<i32>} : memref<80x512xf32, #tpu.memory_space<vmem>>, vector<8x512xf32>,
    %c511_i32 = arith.constant 511 : i32
    %36 = tpu.dynamic_rotate %4 by %c511_i32 dim 1 : vector<8x512xf32>, i32 -> vector<8x512xf32>
    %c5 = arith.constant 5 : index
    %c0_21 = arith.constant 0 : index
    %c0_22 = arith.constant 0 : index
    %37 = vector.load %arg2[%c5, %c0_21, %c0_22] : memref<9x1x512xf32, #tpu.memory_space<vmem>>, vector<1x1x512xf32>
    %38 = vector.shape_cast %37 : vector<1x1x512xf32> to vector<1x512xf32>
    %39 = vector.broadcast %38 : vector<1x512xf32> to vector<8x512xf32>
    %40 = arith.mulf %36, %39 : vector<8x512xf32>
    %c48 = arith.constant 48 : index
    %c0_23 = arith.constant 0 : index
    %41 = vector.load %arg6[%c48, %c0_23] : memref<80x512xf32, #tpu.memory_space<vmem>>, vector<8x512xf32>
    tpu.vector_store %arg6[%c48, %c0_23], %40 {strides = array<i32>} : memref<80x512xf32, #tpu.memory_space<vmem>>, vector<8x512xf32>,
    %c497_i32 = arith.constant 497 : i32
    %42 = tpu.dynamic_rotate %4 by %c497_i32 dim 1 : vector<8x512xf32>, i32 -> vector<8x512xf32>
    %c6 = arith.constant 6 : index
    %c0_24 = arith.constant 0 : index
    %c0_25 = arith.constant 0 : index
    %43 = vector.load %arg2[%c6, %c0_24, %c0_25] : memref<9x1x512xf32, #tpu.memory_space<vmem>>, vector<1x1x512xf32>
    %44 = vector.shape_cast %43 : vector<1x1x512xf32> to vector<1x512xf32>
    %45 = vector.broadcast %44 : vector<1x512xf32> to vector<8x512xf32>
    %46 = arith.mulf %42, %45 : vector<8x512xf32>
    %c56 = arith.constant 56 : index
    %c0_26 = arith.constant 0 : index
    %47 = vector.load %arg6[%c56, %c0_26] : memref<80x512xf32, #tpu.memory_space<vmem>>, vector<8x512xf32>
    tpu.vector_store %arg6[%c56, %c0_26], %46 {strides = array<i32>} : memref<80x512xf32, #tpu.memory_space<vmem>>, vector<8x512xf32>,
    %c496_i32 = arith.constant 496 : i32
    %48 = tpu.dynamic_rotate %4 by %c496_i32 dim 1 : vector<8x512xf32>, i32 -> vector<8x512xf32>
    %c7 = arith.constant 7 : index
    %c0_27 = arith.constant 0 : index
    %c0_28 = arith.constant 0 : index
    %49 = vector.load %arg2[%c7, %c0_27, %c0_28] : memref<9x1x512xf32, #tpu.memory_space<vmem>>, vector<1x1x512xf32>
    %50 = vector.shape_cast %49 : vector<1x1x512xf32> to vector<1x512xf32>
    %51 = vector.broadcast %50 : vector<1x512xf32> to vector<8x512xf32>
    %52 = arith.mulf %48, %51 : vector<8x512xf32>
    %c64 = arith.constant 64 : index
    %c0_29 = arith.constant 0 : index
    %53 = vector.load %arg6[%c64, %c0_29] : memref<80x512xf32, #tpu.memory_space<vmem>>, vector<8x512xf32>
    tpu.vector_store %arg6[%c64, %c0_29], %52 {strides = array<i32>} : memref<80x512xf32, #tpu.memory_space<vmem>>, vector<8x512xf32>,
    %c495_i32 = arith.constant 495 : i32
    %54 = tpu.dynamic_rotate %4 by %c495_i32 dim 1 : vector<8x512xf32>, i32 -> vector<8x512xf32>
    %c8_30 = arith.constant 8 : index
    %c0_31 = arith.constant 0 : index
    %c0_32 = arith.constant 0 : index
    %55 = vector.load %arg2[%c8_30, %c0_31, %c0_32] : memref<9x1x512xf32, #tpu.memory_space<vmem>>, vector<1x1x512xf32>
    %56 = vector.shape_cast %55 : vector<1x1x512xf32> to vector<1x512xf32>
    %57 = vector.broadcast %56 : vector<1x512xf32> to vector<8x512xf32>
    %58 = arith.mulf %54, %57 : vector<8x512xf32>
    %c72 = arith.constant 72 : index
    %c0_33 = arith.constant 0 : index
    %59 = vector.load %arg6[%c72, %c0_33] : memref<80x512xf32, #tpu.memory_space<vmem>>, vector<8x512xf32>
    tpu.vector_store %arg6[%c72, %c0_33], %58 {strides = array<i32>} : memref<80x512xf32, #tpu.memory_space<vmem>>, vector<8x512xf32>,
    %c0_34 = arith.constant 0 : index
    %c0_35 = arith.constant 0 : index
    %60 = vector.load %arg3[%c0_34, %c0_35] : memref<8x80xf32, #tpu.memory_space<vmem>>, vector<8x80xf32>
    %c0_36 = arith.constant 0 : index
    %c0_37 = arith.constant 0 : index
    %61 = vector.load %arg6[%c0_36, %c0_37] : memref<80x512xf32, #tpu.memory_space<vmem>>, vector<80x512xf32>
    %cst = arith.constant dense<0.000000e+00> : vector<8x512xf32>
    %62 = tpu.matmul %60, %61, %cst {dimension_numbers = #tpu.dot_dimension_numbers<[1], [0], [0], [1], [0, 0, 1, 1], [], []>} : vector<8x80xf32>, vector<80x512xf32>, vector<8x512xf32> -> vector<8x512xf32>
    %cst_38 = arith.constant 0.000000e+00 : f32
    %63 = vector.broadcast %cst_38 : f32 to vector<8x512xf32>
    %64 = arith.maximumf %62, %63 : vector<8x512xf32>
    %c17_i32_39 = arith.constant 17 : i32
    %65 = tpu.dynamic_rotate %64 by %c17_i32_39 dim 1 : vector<8x512xf32>, i32 -> vector<8x512xf32>
    %c0_40 = arith.constant 0 : index
    %c0_41 = arith.constant 0 : index
    %c0_42 = arith.constant 0 : index
    %66 = vector.load %arg2[%c0_40, %c0_41, %c0_42] : memref<9x1x512xf32, #tpu.memory_space<vmem>>, vector<1x1x512xf32>
    %67 = vector.shape_cast %66 : vector<1x1x512xf32> to vector<1x512xf32>
    %68 = vector.broadcast %67 : vector<1x512xf32> to vector<8x512xf32>
    %69 = arith.mulf %65, %68 : vector<8x512xf32>
    %c8_43 = arith.constant 8 : index
    %c0_44 = arith.constant 0 : index
    %70 = vector.load %arg6[%c8_43, %c0_44] : memref<80x512xf32, #tpu.memory_space<vmem>>, vector<8x512xf32>
    tpu.vector_store %arg6[%c8_43, %c0_44], %69 {strides = array<i32>} : memref<80x512xf32, #tpu.memory_space<vmem>>, vector<8x512xf32>,
    %c16_i32_45 = arith.constant 16 : i32
    %71 = tpu.dynamic_rotate %64 by %c16_i32_45 dim 1 : vector<8x512xf32>, i32 -> vector<8x512xf32>
    %c1_46 = arith.constant 1 : index
    %c0_47 = arith.constant 0 : index
    %c0_48 = arith.constant 0 : index
    %72 = vector.load %arg2[%c1_46, %c0_47, %c0_48] : memref<9x1x512xf32, #tpu.memory_space<vmem>>, vector<1x1x512xf32>
    %73 = vector.shape_cast %72 : vector<1x1x512xf32> to vector<1x512xf32>
    %74 = vector.broadcast %73 : vector<1x512xf32> to vector<8x512xf32>
    %75 = arith.mulf %71, %74 : vector<8x512xf32>
    %c16_49 = arith.constant 16 : index
    %c0_50 = arith.constant 0 : index
    %76 = vector.load %arg6[%c16_49, %c0_50] : memref<80x512xf32, #tpu.memory_space<vmem>>, vector<8x512xf32>
    tpu.vector_store %arg6[%c16_49, %c0_50], %75 {strides = array<i32>} : memref<80x512xf32, #tpu.memory_space<vmem>>, vector<8x512xf32>,
    %c15_i32_51 = arith.constant 15 : i32
    %77 = tpu.dynamic_rotate %64 by %c15_i32_51 dim 1 : vector<8x512xf32>, i32 -> vector<8x512xf32>
    %c2_52 = arith.constant 2 : index
    %c0_53 = arith.constant 0 : index
    %c0_54 = arith.constant 0 : index
    %78 = vector.load %arg2[%c2_52, %c0_53, %c0_54] : memref<9x1x512xf32, #tpu.memory_space<vmem>>, vector<1x1x512xf32>
    %79 = vector.shape_cast %78 : vector<1x1x512xf32> to vector<1x512xf32>
    %80 = vector.broadcast %79 : vector<1x512xf32> to vector<8x512xf32>
    %81 = arith.mulf %77, %80 : vector<8x512xf32>
    %c24_55 = arith.constant 24 : index
    %c0_56 = arith.constant 0 : index
    %82 = vector.load %arg6[%c24_55, %c0_56] : memref<80x512xf32, #tpu.memory_space<vmem>>, vector<8x512xf32>
    tpu.vector_store %arg6[%c24_55, %c0_56], %81 {strides = array<i32>} : memref<80x512xf32, #tpu.memory_space<vmem>>, vector<8x512xf32>,
    %c1_i32_57 = arith.constant 1 : i32
    %83 = tpu.dynamic_rotate %64 by %c1_i32_57 dim 1 : vector<8x512xf32>, i32 -> vector<8x512xf32>
    %c3_58 = arith.constant 3 : index
    %c0_59 = arith.constant 0 : index
    %c0_60 = arith.constant 0 : index
    %84 = vector.load %arg2[%c3_58, %c0_59, %c0_60] : memref<9x1x512xf32, #tpu.memory_space<vmem>>, vector<1x1x512xf32>
    %85 = vector.shape_cast %84 : vector<1x1x512xf32> to vector<1x512xf32>
    %86 = vector.broadcast %85 : vector<1x512xf32> to vector<8x512xf32>
    %87 = arith.mulf %83, %86 : vector<8x512xf32>
    %c32_61 = arith.constant 32 : index
    %c0_62 = arith.constant 0 : index
    %88 = vector.load %arg6[%c32_61, %c0_62] : memref<80x512xf32, #tpu.memory_space<vmem>>, vector<8x512xf32>
    tpu.vector_store %arg6[%c32_61, %c0_62], %87 {strides = array<i32>} : memref<80x512xf32, #tpu.memory_space<vmem>>, vector<8x512xf32>,
    %c40_63 = arith.constant 40 : index
    %c0_64 = arith.constant 0 : index
    %89 = vector.load %arg6[%c40_63, %c0_64] : memref<80x512xf32, #tpu.memory_space<vmem>>, vector<8x512xf32>
    tpu.vector_store %arg6[%c40_63, %c0_64], %64 {strides = array<i32>} : memref<80x512xf32, #tpu.memory_space<vmem>>, vector<8x512xf32>,
    %c511_i32_65 = arith.constant 511 : i32
    %90 = tpu.dynamic_rotate %64 by %c511_i32_65 dim 1 : vector<8x512xf32>, i32 -> vector<8x512xf32>
    %c5_66 = arith.constant 5 : index
    %c0_67 = arith.constant 0 : index
    %c0_68 = arith.constant 0 : index
    %91 = vector.load %arg2[%c5_66, %c0_67, %c0_68] : memref<9x1x512xf32, #tpu.memory_space<vmem>>, vector<1x1x512xf32>
    %92 = vector.shape_cast %91 : vector<1x1x512xf32> to vector<1x512xf32>
    %93 = vector.broadcast %92 : vector<1x512xf32> to vector<8x512xf32>
    %94 = arith.mulf %90, %93 : vector<8x512xf32>
    %c48_69 = arith.constant 48 : index
    %c0_70 = arith.constant 0 : index
    %95 = vector.load %arg6[%c48_69, %c0_70] : memref<80x512xf32, #tpu.memory_space<vmem>>, vector<8x512xf32>
    tpu.vector_store %arg6[%c48_69, %c0_70], %94 {strides = array<i32>} : memref<80x512xf32, #tpu.memory_space<vmem>>, vector<8x512xf32>,
    %c497_i32_71 = arith.constant 497 : i32
    %96 = tpu.dynamic_rotate %64 by %c497_i32_71 dim 1 : vector<8x512xf32>, i32 -> vector<8x512xf32>
    %c6_72 = arith.constant 6 : index
    %c0_73 = arith.constant 0 : index
    %c0_74 = arith.constant 0 : index
    %97 = vector.load %arg2[%c6_72, %c0_73, %c0_74] : memref<9x1x512xf32, #tpu.memory_space<vmem>>, vector<1x1x512xf32>
    %98 = vector.shape_cast %97 : vector<1x1x512xf32> to vector<1x512xf32>
    %99 = vector.broadcast %98 : vector<1x512xf32> to vector<8x512xf32>
    %100 = arith.mulf %96, %99 : vector<8x512xf32>
    %c56_75 = arith.constant 56 : index
    %c0_76 = arith.constant 0 : index
    %101 = vector.load %arg6[%c56_75, %c0_76] : memref<80x512xf32, #tpu.memory_space<vmem>>, vector<8x512xf32>
    tpu.vector_store %arg6[%c56_75, %c0_76], %100 {strides = array<i32>} : memref<80x512xf32, #tpu.memory_space<vmem>>, vector<8x512xf32>,
    %c496_i32_77 = arith.constant 496 : i32
    %102 = tpu.dynamic_rotate %64 by %c496_i32_77 dim 1 : vector<8x512xf32>, i32 -> vector<8x512xf32>
    %c7_78 = arith.constant 7 : index
    %c0_79 = arith.constant 0 : index
    %c0_80 = arith.constant 0 : index
    %103 = vector.load %arg2[%c7_78, %c0_79, %c0_80] : memref<9x1x512xf32, #tpu.memory_space<vmem>>, vector<1x1x512xf32>
    %104 = vector.shape_cast %103 : vector<1x1x512xf32> to vector<1x512xf32>
    %105 = vector.broadcast %104 : vector<1x512xf32> to vector<8x512xf32>
    %106 = arith.mulf %102, %105 : vector<8x512xf32>
    %c64_81 = arith.constant 64 : index
    %c0_82 = arith.constant 0 : index
    %107 = vector.load %arg6[%c64_81, %c0_82] : memref<80x512xf32, #tpu.memory_space<vmem>>, vector<8x512xf32>
    tpu.vector_store %arg6[%c64_81, %c0_82], %106 {strides = array<i32>} : memref<80x512xf32, #tpu.memory_space<vmem>>, vector<8x512xf32>,
    %c495_i32_83 = arith.constant 495 : i32
    %108 = tpu.dynamic_rotate %64 by %c495_i32_83 dim 1 : vector<8x512xf32>, i32 -> vector<8x512xf32>
    %c8_84 = arith.constant 8 : index
    %c0_85 = arith.constant 0 : index
    %c0_86 = arith.constant 0 : index
    %109 = vector.load %arg2[%c8_84, %c0_85, %c0_86] : memref<9x1x512xf32, #tpu.memory_space<vmem>>, vector<1x1x512xf32>
    %110 = vector.shape_cast %109 : vector<1x1x512xf32> to vector<1x512xf32>
    %111 = vector.broadcast %110 : vector<1x512xf32> to vector<8x512xf32>
    %112 = arith.mulf %108, %111 : vector<8x512xf32>
    %c72_87 = arith.constant 72 : index
    %c0_88 = arith.constant 0 : index
    %113 = vector.load %arg6[%c72_87, %c0_88] : memref<80x512xf32, #tpu.memory_space<vmem>>, vector<8x512xf32>
    tpu.vector_store %arg6[%c72_87, %c0_88], %112 {strides = array<i32>} : memref<80x512xf32, #tpu.memory_space<vmem>>, vector<8x512xf32>,
    %c0_89 = arith.constant 0 : index
    %c0_90 = arith.constant 0 : index
    %114 = vector.load %arg4[%c0_89, %c0_90] : memref<8x80xf32, #tpu.memory_space<vmem>>, vector<8x80xf32>
    %c0_91 = arith.constant 0 : index
    %c0_92 = arith.constant 0 : index
    %115 = vector.load %arg6[%c0_91, %c0_92] : memref<80x512xf32, #tpu.memory_space<vmem>>, vector<80x512xf32>
    %cst_93 = arith.constant dense<0.000000e+00> : vector<8x512xf32>
    %116 = tpu.matmul %114, %115, %cst_93 {dimension_numbers = #tpu.dot_dimension_numbers<[1], [0], [0], [1], [0, 0, 1, 1], [], []>} : vector<8x80xf32>, vector<80x512xf32>, vector<8x512xf32> -> vector<8x512xf32>
    %117 = arith.addf %116, %4 : vector<8x512xf32>
    %cst_94 = arith.constant 0.000000e+00 : f32
    %118 = vector.broadcast %cst_94 : f32 to vector<8x512xf32>
    %119 = arith.maximumf %117, %118 : vector<8x512xf32>
    %120 = vector.extract_strided_slice %119 {offsets = [0, 0], sizes = [4, 256], strides = [1, 1]} : vector<8x512xf32> to vector<4x256xf32>
    %c0_95 = arith.constant 0 : index
    %c0_96 = arith.constant 0 : index
    %c0_97 = arith.constant 0 : index
    %121 = vector.load %arg5[%c0_95, %c0_96, %c0_97] : memref<2x4x256xf32, #tpu.memory_space<vmem>>, vector<1x4x256xf32>
    %122 = vector.shape_cast %121 : vector<1x4x256xf32> to vector<4x256xf32>
    %123 = vector.shape_cast %120 : vector<4x256xf32> to vector<1x4x256xf32>
    tpu.vector_store %arg5[%c0_95, %c0_96, %c0_97], %123 {strides = array<i32>} : memref<2x4x256xf32, #tpu.memory_space<vmem>>, vector<1x4x256xf32>,
    %124 = vector.extract_strided_slice %119 {offsets = [0, 256], sizes = [4, 256], strides = [1, 1]} : vector<8x512xf32> to vector<4x256xf32>
    %c1_98 = arith.constant 1 : index
    %c0_99 = arith.constant 0 : index
    %c0_100 = arith.constant 0 : index
    %125 = vector.load %arg5[%c1_98, %c0_99, %c0_100] : memref<2x4x256xf32, #tpu.memory_space<vmem>>, vector<1x4x256xf32>
    %126 = vector.shape_cast %125 : vector<1x4x256xf32> to vector<4x256xf32>
    %127 = vector.shape_cast %124 : vector<4x256xf32> to vector<1x4x256xf32>
    tpu.vector_store %arg5[%c1_98, %c0_99, %c0_100], %127 {strides = array<i32>} : memref<2x4x256xf32, #tpu.memory_space<vmem>>, vector<1x4x256xf32>,
    return
  }
  func.func @transform_0(%arg0: i32) -> (i32, i32, i32) {
    %c0_i32 = arith.constant 0 : i32
    %c0_i32_0 = arith.constant 0 : i32
    %c0_i32_1 = arith.constant 0 : i32
    return %arg0, %c0_i32, %c0_i32_0 : i32, i32, i32
  }
  func.func @transform_1(%arg0: i32) -> (i32, i32, i32) {
    %c0_i32 = arith.constant 0 : i32
    %c0_i32_0 = arith.constant 0 : i32
    %c0_i32_1 = arith.constant 0 : i32
    %c0_i32_2 = arith.constant 0 : i32
    return %c0_i32, %c0_i32_0, %c0_i32_1 : i32, i32, i32
  }
  func.func @transform_2(%arg0: i32) -> (i32, i32) {
    %c0_i32 = arith.constant 0 : i32
    %c0_i32_0 = arith.constant 0 : i32
    %c0_i32_1 = arith.constant 0 : i32
    return %c0_i32, %c0_i32_0 : i32, i32
  }
  func.func @transform_3(%arg0: i32) -> (i32, i32) {
    %c0_i32 = arith.constant 0 : i32
    %c0_i32_0 = arith.constant 0 : i32
    %c0_i32_1 = arith.constant 0 : i32
    return %c0_i32, %c0_i32_0 : i32, i32
  }
  func.func @transform_4(%arg0: i32) -> (i32, i32, i32) {
    %c0_i32 = arith.constant 0 : i32
    %c0_i32_0 = arith.constant 0 : i32
    %c0_i32_1 = arith.constant 0 : i32
    return %arg0, %c0_i32, %c0_i32_0 : i32, i32, i32
  }
}

</mosaic_0001>

<bundles_post_ra>
// kernel: basic_block_forward.1
= control target key start
LH: loop header
LB: loop body
LE: loop exit
PB: predicated region body
PF: predicated region fallthrough
CT: control target
= control target key end

     0   :  { %s1473_s15 = smov 0   ;;  %s2027_s0 = inlined_call_operand.vmem [shape: f32[4,8,256], index: 0, kind: input, shape index: {}]   ;;  %s2028_s1 = inlined_call_operand.vmem [shape: f32[9,1,512], index: 1, kind: input, shape index: {}]   ;;  %s2029_s2 = inlined_call_operand.vmem [shape: f32[8,80], index: 2, kind: input, shape index: {}]   ;;  %s2030_s3 = inlined_call_operand.vmem [shape: f32[8,80], index: 3, kind: input, shape index: {}]   ;;  %s2031_s4 = inlined_call_operand.vmem [shape: f32[4,4,256], index: 4, kind: output, shape index: {}]  }
   0x1 LB: > { %s1367_s16 = sadd.s32 4294967295, %s1436_s15   ;;  %p1371_p0 = scmp.ge.s32.totalorder %s1436_s15, 1  ;;  %s1436_s15 = sphi %s1473_s15, %s14_s15  }
   0x2   : > { %p164_p1 = scmp.lt.s32.totalorder %s1436_s15, 3 }
   0x4   : > { %p165_p2 = pnand %p1371_p0, %p164_p1 }
   0x5   : > { %s1372_s17 = sshll.u32 (!%p165_p2), %s1367_s16, 1  ;;  %s1438_s22 = smov (!%p165_p2), 111  }
   0x6   : > { %168 = sbr.rel (%p165_p2) target bundleno = 776 (0x308), region = 36  ;;  %p193_p3 = scmp.lt.s32.totalorder (!%p165_p2), %s1372_s17, 3 }
   0x7   : > { %s1439_s23 = smov (!%p165_p2), 112   ;;  %s1440_s24 = smov (!%p165_p2), 113  }
   0x8   : > { %s1441_s25 = smov (!%p165_p2), 127   ;;  %s1442_s26 = smov (!%p165_p2), 1  }
   0x9   : > { %s1443_s27 = smov (!%p165_p2), 15   ;;  %s1444_s28 = smov (!%p165_p2), 16  }
   0xa   : > { %s1446_s29 = smov (!%p165_p2), 17  }
   0xb   : > { %s2033_s17 = smov (!%p193_p3, %s1372_s17), 3  ;;  %v1445_v4 = vmov 0.0   ;;  %v211_v5 = vlaneseq  ;;  %v1387_v14 = vld [vmem:[%s2028_s1 + $0x20] sm:$0xf]  ;;  %v1386_v18 = vld [vmem:[%s2028_s1 + $0x1c] sm:$0xf] }
   0xc   : > { %s1402_s18 = sshll.u32 %s2033_s17, 4  ;;  %686 = vmatprep.mubr.f32.mxu0 %v1445_v4  ;;  %757 = vmatprep.mubr.f32.mxu1 %v1445_v4  ;;  %v1385_v38 = vld [vmem:[%s2028_s1 + $0x18] sm:$0xf]  ;;  %v1384_v55 = vld [vmem:[%s2028_s1 + $0x14] sm:$0xf]  ;;  %vm618_vm9 = vcmask 654336  }
   0xd   : > { %s197_s21 = scalar_lea.vmem %s2027_s0, %s1402_s18  ;;  %v1561_v6 = vshrl.u32 %v211_v5, 7  ;;  %v1563_v7 = vand.u32 127, %v211_v5  ;;  %s1403_s18 = sshll.u32 %s2033_s17, 3 }
   0xe   : > { %v1487_v0 = vld [vmem:[%s197_s21 + $0x8] sm:$0xff]  ;;  %v1489_v1 = vld [vmem:[%s197_s21] sm:$0xff]  ;;  %v1495_v2 = vld [vmem:[%s197_s21 + $0x10] sm:$0xff] }
   0xf   : > { %535 = vrot.lane.b32.xlu0 %v1487_v0, %s1438_s22  ;;  %533 = vrot.lane.b32.xlu1 %v1489_v1, %s1438_s22  ;;  %v1497_v3 = vld [vmem:[%s197_s21 + $0x18] sm:$0xff]  ;;  %v1566_v8 = vsub.s32 1, %v1561_v6  ;;  %v1569_v9 = vsub.s32 2, %v1561_v6  ;;  %v1572_v10 = vsub.s32 3, %v1561_v6  ;;  %v1575_v11 = vsub.s32 0, %v1561_v6  ;;  %s204_s21 = scalar_lea.vmem %s2031_s4, %s1403_s18 }
  0x10   : > { %vm541_vm0 = vcmp.lt.s32.totalorder %v1563_v7, 111  ;;  %vm497_vm1 = vcmp.lt.s32.totalorder %v1563_v7, 112  ;;  %vm453_vm2 = vcmp.lt.s32.totalorder %v1563_v7, 113  ;;  %vm409_vm3 = vcmp.lt.s32.totalorder %v1563_v7, 127 }
  0x11   : > { %v556_v15 = vrot.slane %v1387_v14, %v1566_v8  ;;  %v564_v16 = vrot.slane %v1387_v14, %v1572_v10  ;;  %v560_v17 = vrot.slane %v1387_v14, %v1569_v9  ;;  %v552_v19 = vrot.slane %v1387_v14, %v1575_v11 }
  0x12   : > { %v512_v28 = vrot.slane %v1386_v18, %v1566_v8  ;;  %v508_v35 = vrot.slane %v1386_v18, %v1575_v11  ;;  %v516_v36 = vrot.slane %v1386_v18, %v1569_v9  ;;  %v520_v37 = vrot.slane %v1386_v18, %v1572_v10 }
  0x13   : > { %537 = vrot.lane.b32.xlu0 %v1495_v2, %s1438_s22  ;;  %539 = vrot.lane.b32.xlu1 %v1497_v3, %s1438_s22  ;;  %v468_v47 = vrot.slane %v1385_v38, %v1566_v8  ;;  %v464_v52 = vrot.slane %v1385_v38, %v1575_v11  ;;  %v472_v53 = vrot.slane %v1385_v38, %v1569_v9  ;;  %vm361_vm4 = vcmp.lt.s32.totalorder %v1563_v7, 1 }
  0x14   : > { %v476_v54 = vrot.slane %v1385_v38, %v1572_v10  ;;  %v424_v5 = vrot.slane %v1384_v55, %v1566_v8  ;;  %v432_v18 = vrot.slane %v1384_v55, %v1572_v10  ;;  %vm317_vm5 = vcmp.lt.s32.totalorder %v1563_v7, 15 }
  0x15   : > { %vm273_vm6 = vcmp.lt.s32.totalorder %v1563_v7, 16  ;;  %vm230_vm7 = vcmp.lt.s32.totalorder %v1563_v7, 17  ;;  %vm213_vm8 = vcmp.eq.s32.totalorder %v1561_v6, 0 }
  0x17   : > { %491 = vrot.lane.b32.xlu0 %v1487_v0, %s1439_s23  ;;  %493 = vrot.lane.b32.xlu1 %v1495_v2, %s1439_s23 }
  0x1b   : > { %489 = vrot.lane.b32.xlu0 %v1489_v1, %s1439_s23  ;;  %495 = vrot.lane.b32.xlu1 %v1497_v3, %s1439_s23 }
  0x1f   : > { %447 = vrot.lane.b32.xlu0 %v1487_v0, %s1440_s24  ;;  %449 = vrot.lane.b32.xlu1 %v1495_v2, %s1440_s24 }
  0x23   : > { %445 = vrot.lane.b32.xlu0 %v1489_v1, %s1440_s24  ;;  %451 = vrot.lane.b32.xlu1 %v1497_v3, %s1440_s24 }
  0x27   : > { %403 = vrot.lane.b32.xlu0 %v1487_v0, %s1441_s25  ;;  %405 = vrot.lane.b32.xlu1 %v1495_v2, %s1441_s25 }
  0x2b   : > { %401 = vrot.lane.b32.xlu0 %v1489_v1, %s1441_s25  ;;  %407 = vrot.lane.b32.xlu1 %v1497_v3, %s1441_s25 }
  0x2f   : > { %353 = vrot.lane.b32.xlu0 %v1489_v1, %s1442_s26  ;;  %355 = vrot.lane.b32.xlu1 %v1487_v0, %s1442_s26 }
  0x33   : > { %357 = vrot.lane.b32.xlu0 %v1495_v2, %s1442_s26  ;;  %359 = vrot.lane.b32.xlu1 %v1497_v3, %s1442_s26 }
  0x37   : > { %309 = vrot.lane.b32.xlu0 %v1489_v1, %s1443_s27  ;;  %311 = vrot.lane.b32.xlu1 %v1487_v0, %s1443_s27 }
  0x3b   : > { %313 = vrot.lane.b32.xlu0 %v1495_v2, %s1443_s27  ;;  %315 = vrot.lane.b32.xlu1 %v1497_v3, %s1443_s27 }
  0x3f   : > { %265 = vrot.lane.b32.xlu0 %v1489_v1, %s1444_s28  ;;  %267 = vrot.lane.b32.xlu1 %v1487_v0, %s1444_s28 }
  0x43   : > { %269 = vrot.lane.b32.xlu0 %v1495_v2, %s1444_s28  ;;  %271 = vrot.lane.b32.xlu1 %v1497_v3, %s1444_s28 }
  0x47   : > { %220 = vrot.lane.b32.xlu0 %v1489_v1, %s1446_s29  ;;  %222 = vrot.lane.b32.xlu1 %v1487_v0, %s1446_s29 }
  0x4b   : > { %224 = vrot.lane.b32.xlu0 %v1495_v2, %s1446_s29  ;;  %226 = vrot.lane.b32.xlu1 %v1497_v3, %s1446_s29 }
  0x81   : > { %v536_v12 = vpop.permute.xlu0 %535  ;;  %v534_v13 = vpop.permute.xlu1 %533 }
  0x82   : > { %v544_v20 = vsel %vm541_vm0, %v534_v13, %v536_v12 }
  0x83   : > { %v569_v30 = vmul.f32 %v552_v19, %v544_v20  ;;  %v1383_v19 = vld [vmem:[%s2028_s1 + $0xc] sm:$0xf] }
  0x85   : > { %v538_v21 = vpop.permute.xlu0 %537  ;;  %v540_v22 = vpop.permute.xlu1 %539 }
  0x86   : > { %v542_v23 = vsel %vm541_vm0, %v538_v21, %v540_v22  ;;  %v543_v24 = vsel %vm541_vm0, %v536_v12, %v538_v21  ;;  %v545_v25 = vsel %vm541_vm0, %v540_v22, %v534_v13 }
  0x87   : > { %v570_v26 = vmul.f32 %v556_v15, %v543_v24  ;;  %v572_v27 = vmul.f32 %v564_v16, %v545_v25  ;;  %v571_v29 = vmul.f32 %v560_v17, %v542_v23  ;;  %v420_v16 = vrot.slane %v1384_v55, %v1575_v11 }
  0x88   : > { %v428_v17 = vrot.slane %v1384_v55, %v1569_v9 }
  0x89   : > { %634 = vmatprep.subr.mxu0 %v570_v26  ;;  %v492_v31 = vpop.permute.xlu0 %491  ;;  %705 = vmatprep.subr.mxu1 %v572_v27  ;;  %v494_v32 = vpop.permute.xlu1 %493 }
  0x8a   : > { %v499_v33 = vsel %vm497_vm1, %v492_v31, %v494_v32  ;;  %635 = vmatpush1.msra.mxu0 %v569_v30  ;;  %706 = vmatpush1.msra.mxu1 %v571_v29 }
  0x8b   : > { %v526_v34 = vmul.f32 %v512_v28, %v499_v33  ;;  %v376_v28 = vrot.slane %v1383_v19, %v1566_v8 }
  0x8d   : > { %v490_v39 = vpop.permute.xlu0 %489  ;;  %636 = vmatprep.subr.mxu0 %v526_v34  ;;  %v496_v40 = vpop.permute.xlu1 %495  ;;  %v372_v34 = vrot.slane %v1383_v19, %v1575_v11 }
  0x8e   : > { %v500_v41 = vsel %vm497_vm1, %v490_v39, %v492_v31  ;;  %v498_v42 = vsel %vm497_vm1, %v494_v32, %v496_v40  ;;  %v501_v43 = vsel %vm497_vm1, %v496_v40, %v490_v39  ;;  %v380_v32 = vrot.slane %v1383_v19, %v1569_v9 }
  0x8f   : > { %v525_v44 = vmul.f32 %v508_v35, %v500_v41  ;;  %v527_v45 = vmul.f32 %v516_v36, %v498_v42  ;;  %v528_v46 = vmul.f32 %v520_v37, %v501_v43  ;;  %v384_v35 = vrot.slane %v1383_v19, %v1572_v10  ;;  %v1382_v36 = vld [vmem:[%s2028_s1 + $0x8] sm:$0xf] }
  0x91   : > { %v448_v48 = vpop.permute.xlu0 %447  ;;  %637 = vmatpush1.msra.mxu0 %v525_v44  ;;  %707 = vmatprep.subr.mxu1 %v528_v46  ;;  %v450_v49 = vpop.permute.xlu1 %449 }
  0x92   : > { %v455_v50 = vsel %vm453_vm2, %v448_v48, %v450_v49  ;;  %708 = vmatpush1.msra.mxu1 %v527_v45  ;;  %v332_v45 = vrot.slane %v1382_v36, %v1566_v8 }
  0x93   : > { %v482_v51 = vmul.f32 %v468_v47, %v455_v50  ;;  %v336_v50 = vrot.slane %v1382_v36, %v1569_v9 }
  0x95   : > { %v446_v56 = vpop.permute.xlu0 %445  ;;  %638 = vmatprep.subr.mxu0 %v482_v51  ;;  %v452_v57 = vpop.permute.xlu1 %451  ;;  %v328_v51 = vrot.slane %v1382_v36, %v1575_v11 }
  0x96   : > { %v456_v58 = vsel %vm453_vm2, %v446_v56, %v448_v48  ;;  %v454_v59 = vsel %vm453_vm2, %v450_v49, %v452_v57  ;;  %v457_v60 = vsel %vm453_vm2, %v452_v57, %v446_v56 }
  0x97   : > { %v481_v61 = vmul.f32 %v464_v52, %v456_v58  ;;  %v483_v62 = vmul.f32 %v472_v53, %v454_v59  ;;  %v484_v63 = vmul.f32 %v476_v54, %v457_v60  ;;  %v340_v52 = vrot.slane %v1382_v36, %v1572_v10  ;;  %v1381_v53 = vld [vmem:[%s2028_s1 + $0x4] sm:$0xf] }
  0x99   : > { %v404_v12 = vpop.permute.xlu0 %403  ;;  %639 = vmatpush1.msra.mxu0 %v481_v61  ;;  %709 = vmatprep.subr.mxu1 %v484_v63  ;;  %v406_v13 = vpop.permute.xlu1 %405 }
  0x9a   : > { %v411_v14 = vsel %vm409_vm3, %v404_v12, %v406_v13  ;;  %710 = vmatpush1.msra.mxu1 %v483_v62  ;;  %v288_v62 = vrot.slane %v1381_v53, %v1566_v8 }
  0x9b   : > { %v438_v15 = vmul.f32 %v424_v5, %v411_v14  ;;  %v292_v14 = vrot.slane %v1381_v53, %v1569_v9 }
  0x9d   : > { %v402_v20 = vpop.permute.xlu0 %401  ;;  %640 = vmatprep.subr.mxu0 %v438_v15  ;;  %v408_v21 = vpop.permute.xlu1 %407  ;;  %v284_v15 = vrot.slane %v1381_v53, %v1575_v11 }
  0x9e   : > { %v412_v22 = vsel %vm409_vm3, %v402_v20, %v404_v12  ;;  %v410_v23 = vsel %vm409_vm3, %v406_v13, %v408_v21  ;;  %v413_v24 = vsel %vm409_vm3, %v408_v21, %v402_v20 }
  0x9f   : > { %v437_v25 = vmul.f32 %v420_v16, %v412_v22  ;;  %v439_v26 = vmul.f32 %v428_v17, %v410_v23  ;;  %v440_v27 = vmul.f32 %v432_v18, %v413_v24  ;;  %v296_v16 = vrot.slane %v1381_v53, %v1572_v10  ;;  %v235_v17 = vld [vmem:[%s2028_s1] sm:$0xf] }
  0xa1   : > { %v354_v29 = vpop.permute.xlu0 %353  ;;  %641 = vmatpush1.msra.mxu0 %v437_v25  ;;  %711 = vmatprep.subr.mxu1 %v440_v27  ;;  %v356_v30 = vpop.permute.xlu1 %355 }
  0xa2   : > { %v364_v31 = vsel %vm361_vm4, %v354_v29, %v356_v30  ;;  %712 = vmatpush1.msra.mxu1 %v439_v26  ;;  %642 = vmatprep.subr.mxu0 %v1487_v0  ;;  %v244_v26 = vrot.slane %v235_v17, %v1566_v8 }
  0xa3   : > { %v390_v33 = vmul.f32 %v376_v28, %v364_v31  ;;  %643 = vmatpush1.msra.mxu0 %v1489_v1  ;;  %713 = vmatprep.subr.mxu1 %v1497_v3  ;;  %v248_v31 = vrot.slane %v235_v17, %v1569_v9 }
  0xa4   : > { %714 = vmatpush1.msra.mxu1 %v1495_v2 }
  0xa5   : > { %v358_v37 = vpop.permute.xlu0 %357  ;;  %644 = vmatprep.subr.mxu0 %v390_v33  ;;  %v360_v38 = vpop.permute.xlu1 %359  ;;  %v252_v33 = vrot.slane %v235_v17, %v1572_v10 }
  0xa6   : > { %v363_v39 = vsel %vm361_vm4, %v356_v30, %v358_v37  ;;  %v362_v40 = vsel %vm361_vm4, %v358_v37, %v360_v38  ;;  %v365_v41 = vsel %vm361_vm4, %v360_v38, %v354_v29 }
  0xa7   : > { %v391_v42 = vmul.f32 %v380_v32, %v363_v39  ;;  %v389_v43 = vmul.f32 %v372_v34, %v365_v41  ;;  %v392_v44 = vmul.f32 %v384_v35, %v362_v40  ;;  %v240_v32 = vrot.slane %v235_v17, %v1575_v11 }
  0xa9   : > { %v310_v46 = vpop.permute.xlu0 %309  ;;  %645 = vmatpush1.msra.mxu0 %v389_v43  ;;  %715 = vmatprep.subr.mxu1 %v392_v44  ;;  %v312_v47 = vpop.permute.xlu1 %311  ;;  %v1447_v43 = vmov 1.0  }
  0xaa   : > { %v320_v48 = vsel %vm317_vm5, %v310_v46, %v312_v47  ;;  %716 = vmatpush1.msra.mxu1 %v391_v42  ;;  %v577_v42 = vld [vmem:[%s2029_s2] sm:$0xff] }
  0xab   : > { %v346_v49 = vmul.f32 %v332_v45, %v320_v48 }
  0xad   : > { %v314_v54 = vpop.permute.xlu0 %313  ;;  %646 = vmatprep.subr.mxu0 %v346_v49  ;;  %v316_v55 = vpop.permute.xlu1 %315 }
  0xae   : > { %v319_v56 = vsel %vm317_vm5, %v312_v47, %v314_v54  ;;  %v318_v57 = vsel %vm317_vm5, %v314_v54, %v316_v55  ;;  %v321_v58 = vsel %vm317_vm5, %v316_v55, %v310_v46 }
  0xaf   : > { %v347_v59 = vmul.f32 %v336_v50, %v319_v56  ;;  %v345_v60 = vmul.f32 %v328_v51, %v321_v58  ;;  %v348_v61 = vmul.f32 %v340_v52, %v318_v57  ;;  %v1396_v58 = vld [vmem:[%s2028_s1 + $0x20] sm:$0xf] }
  0xb1   : > { %v266_v63 = vpop.permute.xlu0 %265  ;;  %647 = vmatpush1.msra.mxu0 %v345_v60  ;;  %717 = vmatprep.subr.mxu1 %v348_v61  ;;  %v268_v5 = vpop.permute.xlu1 %267  ;;  %v1091_v60 = vrot.slane %v1396_v58, %v1569_v9  ;;  %v1095_v61 = vrot.slane %v1396_v58, %v1572_v10 }
  0xb2   : > { %v276_v12 = vsel %vm273_vm6, %v266_v63, %v268_v5  ;;  %718 = vmatpush1.msra.mxu1 %v347_v59 }
  0xb3   : > { %v302_v13 = vmul.f32 %v288_v62, %v276_v12 }
  0xb5   : > { %v270_v18 = vpop.permute.xlu0 %269  ;;  %648 = vmatprep.subr.mxu0 %v302_v13  ;;  %v272_v19 = vpop.permute.xlu1 %271 }
  0xb6   : > { %v275_v20 = vsel %vm273_vm6, %v268_v5, %v270_v18  ;;  %v274_v21 = vsel %vm273_vm6, %v270_v18, %v272_v19  ;;  %v277_v22 = vsel %vm273_vm6, %v272_v19, %v266_v63  ;;  %v1827_v63 = vld [vmem:[%s2028_s1 + $0x1c] sm:$0xf]  ;;  %v1842_v19 = vld [vmem:[%s2028_s1 + $0x18] sm:$0xf] }
  0xb7   : > { %v303_v23 = vmul.f32 %v292_v14, %v275_v20  ;;  %v301_v24 = vmul.f32 %v284_v15, %v277_v22  ;;  %v304_v25 = vmul.f32 %v296_v16, %v274_v21  ;;  %v1049_v16 = vrot.slane %v1827_v63, %v1569_v9 }
  0xb8   : > { %v1053_v17 = vrot.slane %v1827_v63, %v1572_v10 }
  0xb9   : > { %v221_v27 = vpop.permute.xlu0 %220  ;;  %649 = vmatpush1.msra.mxu0 %v301_v24  ;;  %719 = vmatprep.subr.mxu1 %v304_v25  ;;  %v223_v28 = vpop.permute.xlu1 %222  ;;  %v1007_v25 = vrot.slane %v1842_v19, %v1569_v9 }
  0xba   : > { %v233_v29 = vsel %vm230_vm7, %v221_v27, %v223_v28  ;;  %720 = vmatpush1.msra.mxu1 %v303_v23 }
  0xbb   : > { %v258_v30 = vmul.f32 %v244_v26, %v233_v29  ;;  %v1011_v26 = vrot.slane %v1842_v19, %v1572_v10 }
  0xbd   : > { %v225_v34 = vpop.permute.xlu0 %224  ;;  %650 = vmatprep.subr.mxu0 %v258_v30  ;;  %v227_v35 = vpop.permute.xlu1 %226 }
  0xbe   : > { %v232_v36 = vsel %vm230_vm7, %v223_v28, %v225_v34  ;;  %v231_v37 = vsel %vm230_vm7, %v225_v34, %v227_v35  ;;  %v234_v38 = vsel %vm230_vm7, %v227_v35, %v221_v27  ;;  %v1859_v28 = vld [vmem:[%s2028_s1 + $0x14] sm:$0xf] }
  0xbf   : > { %v259_v39 = vmul.f32 %v248_v31, %v232_v36  ;;  %v257_v40 = vmul.f32 %v240_v32, %v234_v38  ;;  %v260_v41 = vmul.f32 %v252_v33, %v231_v37  ;;  %v965_v34 = vrot.slane %v1859_v28, %v1569_v9 }
  0xc0   : > { %v969_v35 = vrot.slane %v1859_v28, %v1572_v10 }
  0xc1   : > { %651 = vmatpush1.msra.mxu0 %v257_v40  ;;  %721 = vmatprep.subr.mxu1 %v260_v41 }
  0xc2   : > { %1404 = vmatprep.subr.msk.mxu0 %vm213_vm8, %v1447_v43  ;;  %722 = vmatpush1.msra.mxu1 %v259_v39 }
  0xc3   : > { %1405 = vmatpush1.msk.msra.mxu0 %vm213_vm8, %v1447_v43  ;;  %1406 = vmatprep.subr.msk.mxu1 %vm213_vm8, %v1447_v43 }
  0xc4   : > { %1388 = vmatmul.mubr.msk.f32.vlgmr.msra.gmra.mxu0 %vm618_vm9, %v577_v42  ;;  %1407 = vmatpush1.msk.msra.mxu1 %vm213_vm8, %v1447_v43 }
  0xc5   : > { %1389 = vmatmul.mubr.msk.f32.vlgmr.msra.gmra.mxu1 %vm618_vm9, %v577_v42  ;;  %1216 = vmatprep.mubr.f32.mxu0 %v1445_v4 }
  0xc6   : > { %1287 = vmatprep.mubr.f32.mxu1 %v1445_v4 }
 0x184   : > { %v688_v44 = vpop.f32.mrf.mxu0 }
 0x185   : > { %v1729_v45 = vmax.f32 %v688_v44, 0.0  ;;  %v759_v46 = vpop.f32.mrf.mxu1  ;;  %v1882_v44 = vld [vmem:[%s2028_s1 + $0xc] sm:$0xf] }
 0x186   : > { %v1731_v47 = vmax.f32 %v759_v46, 0.0  ;;  %v690_v49 = vpop.f32.mrf.mxu0 }
 0x187   : > { %1066 = vrot.lane.b32.xlu0 %v1729_v45, %s1438_s22  ;;  %v761_v4 = vpop.f32.mrf.mxu1  ;;  %v1767_v50 = vmax.f32 %v690_v49, 0.0  ;;  %v1087_v49 = vrot.slane %v1396_v58, %v1566_v8 }
 0x188   : > { %1070 = vrot.lane.b32.xlu1 %v1731_v47, %s1438_s22  ;;  %v1749_v48 = vmax.f32 %v761_v4, 0.0  ;;  %v1083_v4 = vrot.slane %v1396_v58, %v1575_v11 }
 0x18b   : > { %1024 = vrot.lane.b32.xlu0 %v1729_v45, %s1439_s23 }
 0x18c   : > { %1028 = vrot.lane.b32.xlu1 %v1731_v47, %s1439_s23 }
 0x18f   : > { %982 = vrot.lane.b32.xlu0 %v1729_v45, %s1440_s24 }
 0x190   : > { %986 = vrot.lane.b32.xlu1 %v1731_v47, %s1440_s24 }
 0x193   : > { %940 = vrot.lane.b32.xlu0 %v1729_v45, %s1441_s25 }
 0x194   : > { %944 = vrot.lane.b32.xlu1 %v1731_v47, %s1441_s25 }
 0x197   : > { %894 = vrot.lane.b32.xlu0 %v1729_v45, %s1442_s26 }
 0x198   : > { %1072 = vrot.lane.b32.xlu1 %v1749_v48, %s1438_s22 }
 0x19b   : > { %898 = vrot.lane.b32.xlu0 %v1731_v47, %s1442_s26 }
 0x19c   : > { %1030 = vrot.lane.b32.xlu1 %v1749_v48, %s1439_s23 }
 0x19f   : > { %852 = vrot.lane.b32.xlu0 %v1729_v45, %s1443_s27 }
 0x1a0   : > { %988 = vrot.lane.b32.xlu1 %v1749_v48, %s1440_s24 }
 0x1a3   : > { %856 = vrot.lane.b32.xlu0 %v1731_v47, %s1443_s27 }
 0x1a4   : > { %946 = vrot.lane.b32.xlu1 %v1749_v48, %s1441_s25 }
 0x1a7   : > { %810 = vrot.lane.b32.xlu0 %v1729_v45, %s1444_s28 }
 0x1a8   : > { %896 = vrot.lane.b32.xlu1 %v1767_v50, %s1442_s26 }
 0x1ab   : > { %1068 = vrot.lane.b32.xlu0 %v1767_v50, %s1438_s22 }
 0x1ac   : > { %900 = vrot.lane.b32.xlu1 %v1749_v48, %s1442_s26 }
 0x1af   : > { %1026 = vrot.lane.b32.xlu0 %v1767_v50, %s1439_s23 }
 0x1b0   : > { %854 = vrot.lane.b32.xlu1 %v1767_v50, %s1443_s27 }
 0x1b3   : > { %984 = vrot.lane.b32.xlu0 %v1767_v50, %s1440_s24 }
 0x1b4   : > { %858 = vrot.lane.b32.xlu1 %v1749_v48, %s1443_s27 }
 0x1b7   : > { %942 = vrot.lane.b32.xlu0 %v1767_v50, %s1441_s25 }
 0x1b8   : > { %812 = vrot.lane.b32.xlu1 %v1767_v50, %s1444_s28 }
 0x1bb   : > { %814 = vrot.lane.b32.xlu0 %v1731_v47, %s1444_s28 }
 0x1bc   : > { %816 = vrot.lane.b32.xlu1 %v1749_v48, %s1444_s28 }
 0x1bf   : > { %768 = vrot.lane.b32.xlu0 %v1729_v45, %s1446_s29 }
 0x1c0   : > { %770 = vrot.lane.b32.xlu1 %v1767_v50, %s1446_s29 }
 0x1c3   : > { %772 = vrot.lane.b32.xlu0 %v1731_v47, %s1446_s29 }
 0x1c4   : > { %774 = vrot.lane.b32.xlu1 %v1749_v48, %s1446_s29 }
 0x1f9   : > { %v1801_v51 = vpop.permute.xlu0 %1066 }
 0x1fa   : > { %v1803_v52 = vpop.permute.xlu1 %1070 }
 0x1fd   : > { %v1805_v53 = vpop.permute.xlu0 %1024 }
 0x1fe   : > { %v1807_v54 = vpop.permute.xlu1 %1028 }
 0x201   : > { %v1809_v55 = vpop.permute.xlu0 %982 }
 0x202   : > { %v1811_v56 = vpop.permute.xlu1 %986 }
 0x205   : > { %v1813_v57 = vpop.permute.xlu0 %940 }
 0x206   : > { %v1818_v59 = vpop.permute.xlu1 %944 }
 0x209   : > { %v1822_v62 = vpop.permute.xlu0 %894 }
 0x20a   : > { %v1073_v5 = vpop.permute.xlu1 %1072 }
 0x20b   : > { %v1074_v12 = vsel %vm541_vm0, %v1803_v52, %v1073_v5  ;;  %v1077_v13 = vsel %vm541_vm0, %v1073_v5, %v1801_v51 }
 0x20c   : > { %v1102_v14 = vmul.f32 %v1091_v60, %v1074_v12  ;;  %v1103_v15 = vmul.f32 %v1095_v61, %v1077_v13  ;;  %v923_v60 = vrot.slane %v1882_v44, %v1572_v10  ;;  %v919_v61 = vrot.slane %v1882_v44, %v1569_v9 }
 0x20d   : > { %v899_v18 = vpop.permute.xlu0 %898 }
 0x20e   : > { %1235 = vmatprep.subr.mxu1 %v1103_v15  ;;  %v1031_v20 = vpop.permute.xlu1 %1030 }
 0x20f   : > { %v1032_v21 = vsel %vm497_vm1, %v1807_v54, %v1031_v20  ;;  %v1035_v22 = vsel %vm497_vm1, %v1031_v20, %v1805_v53  ;;  %1236 = vmatpush1.msra.mxu1 %v1102_v14  ;;  %v1041_v14 = vrot.slane %v1827_v63, %v1575_v11 }
 0x210   : > { %v1060_v23 = vmul.f32 %v1049_v16, %v1032_v21  ;;  %v1061_v24 = vmul.f32 %v1053_v17, %v1035_v22  ;;  %v1045_v17 = vrot.slane %v1827_v63, %v1566_v8 }
 0x211   : > { %v1854_v27 = vpop.permute.xlu0 %852 }
 0x212   : > { %1237 = vmatprep.subr.mxu1 %v1061_v24  ;;  %v989_v29 = vpop.permute.xlu1 %988 }
 0x213   : > { %v990_v30 = vsel %vm453_vm2, %v1811_v56, %v989_v29  ;;  %v993_v31 = vsel %vm453_vm2, %v989_v29, %v1809_v55  ;;  %1238 = vmatpush1.msra.mxu1 %v1060_v23 }
 0x214   : > { %v1018_v32 = vmul.f32 %v1007_v25, %v990_v30  ;;  %v1019_v33 = vmul.f32 %v1011_v26, %v993_v31  ;;  %v999_v25 = vrot.slane %v1842_v19, %v1575_v11 }
 0x215   : > { %v857_v36 = vpop.permute.xlu0 %856 }
 0x216   : > { %1239 = vmatprep.subr.mxu1 %v1019_v33  ;;  %v947_v37 = vpop.permute.xlu1 %946  ;;  %v957_v33 = vrot.slane %v1859_v28, %v1575_v11 }
 0x217   : > { %v948_v38 = vsel %vm409_vm3, %v1818_v59, %v947_v37  ;;  %v951_v39 = vsel %vm409_vm3, %v947_v37, %v1813_v57  ;;  %1240 = vmatpush1.msra.mxu1 %v1018_v32 }
 0x218   : > { %v976_v40 = vmul.f32 %v965_v34, %v948_v38  ;;  %v977_v41 = vmul.f32 %v969_v35, %v951_v39  ;;  %v961_v38 = vrot.slane %v1859_v28, %v1566_v8 }
 0x219   : > { %v1877_v42 = vpop.permute.xlu0 %810 }
 0x21a   : > { %1241 = vmatprep.subr.mxu1 %v977_v41  ;;  %v897_v46 = vpop.permute.xlu1 %896 }
 0x21b   : > { %1242 = vmatpush1.msra.mxu1 %v976_v40  ;;  %v903_v12 = vsel %vm361_vm4, %v897_v46, %v899_v18 }
 0x21c   : > { %1243 = vmatprep.subr.mxu1 %v1749_v48  ;;  %v930_v21 = vmul.f32 %v919_v61, %v903_v12 }
 0x21d   : > { %v1069_v5 = vpop.permute.xlu0 %1068  ;;  %1244 = vmatpush1.msra.mxu1 %v1731_v47 }
 0x21e   : > { %v1075_v13 = vsel %vm541_vm0, %v1069_v5, %v1803_v52  ;;  %v1076_v48 = vsel %vm541_vm0, %v1801_v51, %v1069_v5  ;;  %v901_v58 = vpop.permute.xlu1 %900 }
 0x21f   : > { %v1100_v15 = vmul.f32 %v1083_v4, %v1076_v48  ;;  %v1101_v16 = vmul.f32 %v1087_v49, %v1075_v13  ;;  %v902_v47 = vsel %vm361_vm4, %v899_v18, %v901_v58  ;;  %v1915_v18 = vld [vmem:[%s2028_s1 + $0x8] sm:$0xf]  ;;  %v905_v5 = vsel %vm361_vm4, %v901_v58, %v1822_v62 }
 0x220   : > { %v931_v20 = vmul.f32 %v923_v60, %v902_v47  ;;  %v877_v26 = vrot.slane %v1915_v18, %v1569_v9  ;;  %v1390_v60 = vld [vmem:[%s2028_s1 + $0x4] sm:$0xf]  ;;  %v873_v12 = vrot.slane %v1915_v18, %v1566_v8 }
 0x221   : > { %v1027_v22 = vpop.permute.xlu0 %1026  ;;  %1164 = vmatprep.subr.mxu0 %v1101_v16  ;;  %v839_v61 = vrot.slane %v1390_v60, %v1572_v10  ;;  %v835_v13 = vrot.slane %v1390_v60, %v1569_v9 }
 0x222   : > { %v1033_v51 = vsel %vm497_vm1, %v1027_v22, %v1807_v54  ;;  %v1034_v52 = vsel %vm497_vm1, %v1805_v53, %v1027_v22  ;;  %1165 = vmatpush1.msra.mxu0 %v1100_v15  ;;  %1245 = vmatprep.subr.mxu1 %v931_v20  ;;  %v855_v63 = vpop.permute.xlu1 %854  ;;  %v1003_v54 = vrot.slane %v1842_v19, %v1566_v8 }
 0x223   : > { %v1058_v23 = vmul.f32 %v1041_v14, %v1034_v52  ;;  %v1059_v24 = vmul.f32 %v1045_v17, %v1033_v51  ;;  %1246 = vmatpush1.msra.mxu1 %v930_v21  ;;  %v881_v53 = vrot.slane %v1915_v18, %v1572_v10  ;;  %v861_v30 = vsel %vm317_vm5, %v855_v63, %v857_v36 }
 0x224   : > { %v888_v40 = vmul.f32 %v877_v26, %v861_v30  ;;  %v869_v14 = vrot.slane %v1915_v18, %v1575_v11  ;;  %v827_v17 = vrot.slane %v1390_v60, %v1575_v11 }
 0x225   : > { %v985_v29 = vpop.permute.xlu0 %984  ;;  %1166 = vmatprep.subr.mxu0 %v1059_v24 }
 0x226   : > { %v991_v31 = vsel %vm453_vm2, %v985_v29, %v1811_v56  ;;  %v992_v32 = vsel %vm453_vm2, %v1809_v55, %v985_v29  ;;  %1167 = vmatpush1.msra.mxu0 %v1058_v23  ;;  %v859_v19 = vpop.permute.xlu1 %858 }
 0x227   : > { %v1016_v34 = vmul.f32 %v999_v25, %v992_v32  ;;  %v1017_v35 = vmul.f32 %v1003_v54, %v991_v31  ;;  %v860_v37 = vsel %vm317_vm5, %v857_v36, %v859_v19  ;;  %v915_v36 = vrot.slane %v1882_v44, %v1566_v8 }
 0x228   : > { %v889_v39 = vmul.f32 %v881_v53, %v860_v37  ;;  %v863_v47 = vsel %vm317_vm5, %v859_v19, %v1854_v27 }
 0x229   : > { %v943_v56 = vpop.permute.xlu0 %942  ;;  %1168 = vmatprep.subr.mxu0 %v1017_v35  ;;  %v886_v24 = vmul.f32 %v869_v14, %v863_v47 }
 0x22a   : > { %v949_v55 = vsel %vm409_vm3, %v943_v56, %v1818_v59  ;;  %v950_v41 = vsel %vm409_vm3, %v1813_v57, %v943_v56  ;;  %1169 = vmatpush1.msra.mxu0 %v1016_v34  ;;  %1247 = vmatprep.subr.mxu1 %v889_v39  ;;  %v813_v4 = vpop.permute.xlu1 %812  ;;  %v904_v59 = vsel %vm361_vm4, %v1822_v62, %v897_v46  ;;  %v780_v46 = vld [vmem:[%s2028_s1] sm:$0xf] }
 0x22b   : > { %v974_v49 = vmul.f32 %v957_v33, %v950_v41  ;;  %v975_v28 = vmul.f32 %v961_v38, %v949_v55  ;;  %1248 = vmatpush1.msra.mxu1 %v888_v40  ;;  %v911_v57 = vrot.slane %v1882_v44, %v1575_v11  ;;  %v862_v44 = vsel %vm317_vm5, %v1854_v27, %v855_v63 }
 0x22c   : > { %v831_v62 = vrot.slane %v1390_v60, %v1566_v8  ;;  %v929_v16 = vmul.f32 %v915_v36, %v904_v59  ;;  %v820_v22 = vsel %vm273_vm6, %v1877_v42, %v813_v4  ;;  %v789_v52 = vrot.slane %v780_v46, %v1566_v8 }
 0x22d   : > { %v815_v48 = vpop.permute.xlu0 %814  ;;  %1170 = vmatprep.subr.mxu0 %v975_v28  ;;  %v928_v21 = vmul.f32 %v911_v57, %v905_v5  ;;  %v887_v18 = vmul.f32 %v873_v12, %v862_v44  ;;  %v785_v53 = vrot.slane %v780_v46, %v1575_v11  ;;  %v797_v26 = vrot.slane %v780_v46, %v1572_v10 }
 0x22e   : > { %v819_v58 = vsel %vm273_vm6, %v813_v4, %v815_v48  ;;  %1171 = vmatpush1.msra.mxu0 %v974_v49  ;;  %v817_v15 = vpop.permute.xlu1 %816  ;;  %v845_v25 = vmul.f32 %v831_v62, %v820_v22 }
 0x22f   : > { %v818_v20 = vsel %vm273_vm6, %v815_v48, %v817_v15  ;;  %1172 = vmatprep.subr.mxu0 %v1767_v50  ;;  %v846_v63 = vmul.f32 %v835_v13, %v819_v58  ;;  %v821_v27 = vsel %vm273_vm6, %v817_v15, %v1877_v42  ;;  %v793_v42 = vrot.slane %v780_v46, %v1569_v9  ;;  %v1108_v9 = vld [vmem:[%s2030_s3] sm:$0xff] }
 0x230   : > { %v847_v51 = vmul.f32 %v839_v61, %v818_v20  ;;  %1173 = vmatpush1.msra.mxu0 %v1729_v45  ;;  %v844_v45 = vmul.f32 %v827_v17, %v821_v27 }
 0x231   : > { %v769_v23 = vpop.permute.xlu0 %768  ;;  %1174 = vmatprep.subr.mxu0 %v929_v16 }
 0x232   : > { %1175 = vmatpush1.msra.mxu0 %v928_v21  ;;  %1249 = vmatprep.subr.mxu1 %v847_v51  ;;  %v771_v50 = vpop.permute.xlu1 %770 }
 0x233   : > { %v778_v54 = vsel %vm230_vm7, %v769_v23, %v771_v50  ;;  %1176 = vmatprep.subr.mxu0 %v887_v18  ;;  %1250 = vmatpush1.msra.mxu1 %v846_v63 }
 0x234   : > { %v803_v8 = vmul.f32 %v789_v52, %v778_v54  ;;  %1177 = vmatpush1.msra.mxu0 %v886_v24 }
 0x235   : > { %v773_v29 = vpop.permute.xlu0 %772  ;;  %1178 = vmatprep.subr.mxu0 %v845_v25 }
 0x236   : > { %v777_v30 = vsel %vm230_vm7, %v771_v50, %v773_v29  ;;  %1179 = vmatpush1.msra.mxu0 %v844_v45  ;;  %v775_v31 = vpop.permute.xlu1 %774 }
 0x237   : > { %v776_v32 = vsel %vm230_vm7, %v773_v29, %v775_v31  ;;  %v779_v19 = vsel %vm230_vm7, %v775_v31, %v769_v23  ;;  %1180 = vmatprep.subr.mxu0 %v803_v8  ;;  %v804_v34 = vmul.f32 %v793_v42, %v777_v30 }
 0x238   : > { %v802_v33 = vmul.f32 %v785_v53, %v779_v19  ;;  %v805_v11 = vmul.f32 %v797_v26, %v776_v32 }
 0x23a   : > { %1181 = vmatpush1.msra.mxu0 %v802_v33  ;;  %1251 = vmatprep.subr.mxu1 %v805_v11 }
 0x23b   : > { %1408 = vmatprep.subr.msk.mxu0 %vm213_vm8, %v1447_v43  ;;  %1252 = vmatpush1.msra.mxu1 %v804_v34 }
 0x23c   : > { %1409 = vmatpush1.msk.msra.mxu0 %vm213_vm8, %v1447_v43  ;;  %1410 = vmatprep.subr.msk.mxu1 %vm213_vm8, %v1447_v43 }
 0x23d   : > { %1397 = vmatmul.mubr.msk.f32.vlgmr.msra.gmra.mxu0 %vm618_vm9, %v1108_v9  ;;  %1411 = vmatpush1.msk.msra.mxu1 %vm213_vm8, %v1447_v43 }
 0x23e   : > { %1398 = vmatmul.mubr.msk.f32.vlgmr.msra.gmra.mxu1 %vm618_vm9, %v1108_v9 }
 0x2fd   : > { %v1218_v7 = vpop.f32.mrf.mxu0 }
 0x2fe   : > { %v1219_v10 = vadd.f32 %v1218_v7, %v1489_v1  ;;  %v1289_v35 = vpop.f32.mrf.mxu1 }
 0x2ff   : > { %v1290_v37 = vadd.f32 %v1495_v2, %v1289_v35  ;;  %v1220_v38 = vpop.f32.mrf.mxu0 }
 0x300   : > { %v1221_v39 = vadd.f32 %v1220_v38, %v1487_v0  ;;  %v1291_v40 = vpop.f32.mrf.mxu1  ;;  %v1294_v55 = vmax.f32 %v1219_v10, 0.0 }
 0x301   : > { %v1292_v56 = vadd.f32 %v1497_v3, %v1291_v40  ;;  %v1296_v4 = vmax.f32 %v1290_v37, 0.0 }
 0x302   : > { %v1295_v41 = vmax.f32 %v1221_v39, 0.0 }
 0x303   : > { %v1297_v6 = vmax.f32 %v1292_v56, 0.0 }
 0x304   : > { %v1300_v43 = vcombine.low %v1294_v55, %v1295_v41 }
 0x305   : > { %v1305_v1 = vcombine.low %v1296_v4, %v1297_v6 }
 0x306   : > { %1302 = vst [vmem:[%s204_s21] sm:$0xff] %v1300_v43 }
 0x307   : > { %1399 = vst [vmem:[%s204_s21 + $0x8] sm:$0xff] %v1305_v1 }
 0x308 PF: > { %s14_s15 = sadd.s32 1, %s1436_s15  }
 0x309   : > { %p11_p4 = scmp.ge.s32.totalorder %s14_s15, 4  }
 0x30b   :  { %13 = sbr.rel (!%p11_p4) target bundleno = 1 (0x1), region = 75 }

</bundles_post_ra>
